<compile_context>
chip_gen: v6e
topology: v6e:2x2x1
jax: 0.10.0
libtpu: 0.0.40
codegen_flags: <defaults>
</compile_context>

<pallas_src>
import functools

import jax
import jax.numpy as jnp
from jax.experimental import pallas as pl
from jax.experimental.pallas import tpu as pltpu

LANE = 128  # lane-dense padded width for hidden feature dims


def _dqn_kernel(x_ref, w1_ref, b1_ref, w2_ref, b2_ref, w3_ref, b3_ref, o_ref,
                *, out_dim):
    # fc1: bf16 operands on the MXU, f32 accumulation; bias + ReLU in f32.
    h1 = jnp.dot(x_ref[...], w1_ref[...], preferred_element_type=jnp.float32)
    h1 = jnp.maximum(h1 + b1_ref[...], 0.0)
    # fc2
    h2 = jnp.dot(h1.astype(w2_ref.dtype), w2_ref[...],
                 preferred_element_type=jnp.float32)
    h2 = jnp.maximum(h2 + b2_ref[...], 0.0)
    # fc3 (no activation); compute lane-dense, store only the real out_dim cols.
    out = jnp.dot(h2.astype(w3_ref.dtype), w3_ref[...],
                  preferred_element_type=jnp.float32) + b3_ref[...]
    o_ref[...] = out[:, :out_dim].astype(o_ref.dtype)


def _pad2d(a, rows, cols):
    return jnp.pad(a, ((0, rows - a.shape[0]), (0, cols - a.shape[1])))


def _round_up(n, m):
    return ((n + m - 1) // m) * m


def dqn_forward(x, params, *, tile_b=1024, compute_dtype=jnp.bfloat16):
    """x: (B, input_dim) f32. params: w{i}: (in, out) f32, b{i}: (1, out) f32."""
    w1, b1, w2, b2, w3, b3 = (params[k] for k in ("w1", "b1", "w2", "b2", "w3", "b3"))
    B, input_dim = x.shape
    out_dim = w3.shape[1]

    # Lane-dense zero padding of the hidden dims (padded hidden columns are
    # ReLU(0 + 0) = 0 and contribute nothing downstream -> exact same math).
    w1p = _pad2d(w1, input_dim, LANE).astype(compute_dtype)
    w2p = _pad2d(w2, LANE, LANE).astype(compute_dtype)
    w3p = _pad2d(w3, LANE, LANE).astype(compute_dtype)
    b1p = _pad2d(b1, 1, LANE)  # biases stay f32 (f32 elementwise path)
    b2p = _pad2d(b2, 1, LANE)
    b3p = _pad2d(b3, 1, LANE)

    # Batch: pad only to a multiple of 16 (bf16 sublane pack); the ragged last
    # block (when tile_b does not divide Bp) is handled by Pallas.
    Bp = _round_up(B, 16)
    tile_b = max(16, min(_round_up(tile_b, 16), Bp))
    # Keep >=2 grid steps when there is enough work: v7x megacore shards the
    # "parallel" batch axis across its 2 TensorCores, and multiple steps let
    # the x/out DMAs overlap compute on single-core chips.
    if Bp >= 32:
        tile_b = min(tile_b, _round_up(pl.cdiv(Bp, 2), 16))
    grid = (pl.cdiv(Bp, tile_b),)

    xp = jnp.pad(x, ((0, Bp - B), (0, 0))).astype(compute_dtype)

    itemsize_c = jnp.dtype(compute_dtype).itemsize
    cost = pl.CostEstimate(
        flops=2 * Bp * (input_dim * LANE + LANE * LANE + LANE * LANE),
        transcendentals=0,
        bytes_accessed=(Bp * input_dim * itemsize_c              # x stream
                        + (input_dim + 2 * LANE) * LANE * itemsize_c  # weights
                        + 3 * LANE * 4                           # biases
                        + Bp * out_dim * 4),                     # narrow output
    )

    kernel = functools.partial(_dqn_kernel, out_dim=out_dim)

    out = pl.pallas_call(
        kernel,
        out_shape=jax.ShapeDtypeStruct((Bp, out_dim), jnp.float32),
        grid=grid,
        in_specs=[
            pl.BlockSpec((tile_b, input_dim), lambda i: (i, 0)),   # x tile (pipelined)
            pl.BlockSpec((input_dim, LANE), lambda i: (0, 0)),     # w1 (resident)
            pl.BlockSpec((1, LANE), lambda i: (0, 0)),             # b1
            pl.BlockSpec((LANE, LANE), lambda i: (0, 0)),          # w2
            pl.BlockSpec((1, LANE), lambda i: (0, 0)),             # b2
            pl.BlockSpec((LANE, LANE), lambda i: (0, 0)),          # w3
            pl.BlockSpec((1, LANE), lambda i: (0, 0)),             # b3
        ],
        out_specs=pl.BlockSpec((tile_b, out_dim), lambda i: (i, 0)),  # narrow store
        compiler_params=pltpu.CompilerParams(
            dimension_semantics=("parallel",),
        ),
        cost_estimate=cost,
    )(xp, w1p, b1p, w2p, b2p, w3p, b3p)

    # Only strip the (<=15 row) sublane padding; columns are already exact.
    return out[:B] if Bp != B else out


def init_dqn_params(key, input_dim, output_dim):
    """Deterministic init mimicking PyTorch nn.Linear default U[-1/sqrt(fan_in), ...]."""
    dims = [(input_dim, 64), (64, 32), (32, output_dim)]
    params = {}
    for i, (fan_in, fan_out) in enumerate(dims, start=1):
        key, kw, kb = jax.random.split(key, 3)
        bound = 1.0 / (fan_in ** 0.5)
        params[f"w{i}"] = jax.random.uniform(
            kw, (fan_in, fan_out), jnp.float32, minval=-bound, maxval=bound
        )
        params[f"b{i}"] = jax.random.uniform(
            kb, (1, fan_out), jnp.float32, minval=-bound, maxval=bound
        )
    return params


def dqn_reference(x, params):
    h1 = jnp.maximum(x @ params["w1"] + params["b1"], 0.0)
    h2 = jnp.maximum(h1 @ params["w2"] + params["b2"], 0.0)
    return h2 @ params["w3"] + params["b3"]


if __name__ == "__main__":
    key = jax.random.PRNGKey(0)
    key, kx = jax.random.split(key)

    batch = 8
    input_dim = 16   # state dimension
    output_dim = 4   # number of actions

    x = jax.random.normal(kx, (batch, input_dim), dtype=jnp.float32)
    params = init_dqn_params(key, input_dim, output_dim)

    q_values = dqn_forward(x, params)
    jax.block_until_ready(q_values)

    # sanity check against pure-JAX f32 reference (loose tol due to bf16 operands)
    q_ref = dqn_reference(x, params)
    assert q_values.shape == (batch, output_dim)
    assert jnp.allclose(q_values, q_ref, atol=3e-2, rtol=3e-2), (
        jnp.max(jnp.abs(q_values - q_ref))
    )

    # also exercise a batch that is not a multiple of the tile (ragged last block)
    key, kx2 = jax.random.split(key)
    x2 = jax.random.normal(kx2, (37, input_dim), dtype=jnp.float32)
    q2 = dqn_forward(x2, params, tile_b=32)
    jax.block_until_ready(q2)
    q2_ref = dqn_reference(x2, params)
    assert q2.shape == (37, output_dim)
    assert jnp.allclose(q2, q2_ref, atol=3e-2, rtol=3e-2), (
        jnp.max(jnp.abs(q2 - q2_ref))
    )

    print("KERNEL_OK")
</pallas_src>

<mosaic_0001>
module attributes {stable_mosaic.version = 11 : i64} {
  func.func @_dqn_kernel(%arg0: i32, %arg1: memref<16x16xbf16, #tpu.memory_space<vmem>>, %arg2: memref<16x128xbf16, #tpu.memory_space<vmem>>, %arg3: memref<1x128xf32, #tpu.memory_space<vmem>>, %arg4: memref<128x128xbf16, #tpu.memory_space<vmem>>, %arg5: memref<1x128xf32, #tpu.memory_space<vmem>>, %arg6: memref<128x128xbf16, #tpu.memory_space<vmem>>, %arg7: memref<1x128xf32, #tpu.memory_space<vmem>>, %arg8: memref<16x4xf32, #tpu.memory_space<vmem>>) attributes {dimension_semantics = [#tpu.dimension_semantics<parallel>], iteration_bounds = array<i64: 1>, scalar_prefetch = 0 : i64, scratch_operands = 0 : i64, tpu.core_type = #tpu.core_type<tc>, window_params = [{transform_indices = @transform_0, window_bounds = array<i64: 16, 16>}, {pipeline_mode = #tpu.pipeline_mode<synchronous>, transform_indices = @transform_1, window_bounds = array<i64: 16, 128>}, {pipeline_mode = #tpu.pipeline_mode<synchronous>, transform_indices = @transform_2, window_bounds = array<i64: 1, 128>}, {pipeline_mode = #tpu.pipeline_mode<synchronous>, transform_indices = @transform_3, window_bounds = array<i64: 128, 128>}, {pipeline_mode = #tpu.pipeline_mode<synchronous>, transform_indices = @transform_4, window_bounds = array<i64: 1, 128>}, {pipeline_mode = #tpu.pipeline_mode<synchronous>, transform_indices = @transform_5, window_bounds = array<i64: 128, 128>}, {pipeline_mode = #tpu.pipeline_mode<synchronous>, transform_indices = @transform_6, window_bounds = array<i64: 1, 128>}, {transform_indices = @transform_7, window_bounds = array<i64: 16, 4>}]} {
    %c0 = arith.constant 0 : index
    %c0_0 = arith.constant 0 : index
    %0 = vector.load %arg1[%c0, %c0_0] : memref<16x16xbf16, #tpu.memory_space<vmem>>, vector<16x16xbf16>
    %c0_1 = arith.constant 0 : index
    %c0_2 = arith.constant 0 : index
    %1 = vector.load %arg2[%c0_1, %c0_2] : memref<16x128xbf16, #tpu.memory_space<vmem>>, vector<16x128xbf16>
    %cst = arith.constant dense<0.000000e+00> : vector<16x128xf32>
    %2 = tpu.matmul %0, %1, %cst {dimension_numbers = #tpu.dot_dimension_numbers<[1], [0], [0], [1], [0, 0, 1, 1], [], []>} : vector<16x16xbf16>, vector<16x128xbf16>, vector<16x128xf32> -> vector<16x128xf32>
    %c0_3 = arith.constant 0 : index
    %c0_4 = arith.constant 0 : index
    %3 = vector.load %arg3[%c0_3, %c0_4] : memref<1x128xf32, #tpu.memory_space<vmem>>, vector<1x128xf32>
    %4 = vector.broadcast %3 : vector<1x128xf32> to vector<16x128xf32>
    %5 = arith.addf %2, %4 : vector<16x128xf32>
    %cst_5 = arith.constant 0.000000e+00 : f32
    %6 = vector.broadcast %cst_5 : f32 to vector<16x128xf32>
    %7 = arith.maximumf %5, %6 : vector<16x128xf32>
    %8 = arith.truncf %7 : vector<16x128xf32> to vector<16x128xbf16>
    %c0_6 = arith.constant 0 : index
    %c0_7 = arith.constant 0 : index
    %9 = vector.load %arg4[%c0_6, %c0_7] : memref<128x128xbf16, #tpu.memory_space<vmem>>, vector<128x128xbf16>
    %cst_8 = arith.constant dense<0.000000e+00> : vector<16x128xf32>
    %10 = tpu.matmul %8, %9, %cst_8 {dimension_numbers = #tpu.dot_dimension_numbers<[1], [0], [0], [1], [0, 0, 1, 1], [], []>} : vector<16x128xbf16>, vector<128x128xbf16>, vector<16x128xf32> -> vector<16x128xf32>
    %c0_9 = arith.constant 0 : index
    %c0_10 = arith.constant 0 : index
    %11 = vector.load %arg5[%c0_9, %c0_10] : memref<1x128xf32, #tpu.memory_space<vmem>>, vector<1x128xf32>
    %12 = vector.broadcast %11 : vector<1x128xf32> to vector<16x128xf32>
    %13 = arith.addf %10, %12 : vector<16x128xf32>
    %cst_11 = arith.constant 0.000000e+00 : f32
    %14 = vector.broadcast %cst_11 : f32 to vector<16x128xf32>
    %15 = arith.maximumf %13, %14 : vector<16x128xf32>
    %16 = arith.truncf %15 : vector<16x128xf32> to vector<16x128xbf16>
    %c0_12 = arith.constant 0 : index
    %c0_13 = arith.constant 0 : index
    %17 = vector.load %arg6[%c0_12, %c0_13] : memref<128x128xbf16, #tpu.memory_space<vmem>>, vector<128x128xbf16>
    %cst_14 = arith.constant dense<0.000000e+00> : vector<16x128xf32>
    %18 = tpu.matmul %16, %17, %cst_14 {dimension_numbers = #tpu.dot_dimension_numbers<[1], [0], [0], [1], [0, 0, 1, 1], [], []>} : vector<16x128xbf16>, vector<128x128xbf16>, vector<16x128xf32> -> vector<16x128xf32>
    %c0_15 = arith.constant 0 : index
    %c0_16 = arith.constant 0 : index
    %19 = vector.load %arg7[%c0_15, %c0_16] : memref<1x128xf32, #tpu.memory_space<vmem>>, vector<1x128xf32>
    %20 = vector.broadcast %19 : vector<1x128xf32> to vector<16x128xf32>
    %21 = arith.addf %18, %20 : vector<16x128xf32>
    %22 = vector.extract_strided_slice %21 {offsets = [0, 0], sizes = [16, 4], strides = [1, 1]} : vector<16x128xf32> to vector<16x4xf32>
    %c0_17 = arith.constant 0 : index
    %c0_18 = arith.constant 0 : index
    %23 = vector.load %arg8[%c0_17, %c0_18] : memref<16x4xf32, #tpu.memory_space<vmem>>, vector<16x4xf32>
    tpu.vector_store %arg8[%c0_17, %c0_18], %22 {strides = array<i32>} : memref<16x4xf32, #tpu.memory_space<vmem>>, vector<16x4xf32>,
    return
  }
  func.func @transform_0(%arg0: i32) -> (i32, i32) {
    %c0_i32 = arith.constant 0 : i32
    %c0_i32_0 = arith.constant 0 : i32
    return %arg0, %c0_i32 : i32, i32
  }
  func.func @transform_1(%arg0: i32) -> (i32, i32) {
    %c0_i32 = arith.constant 0 : i32
    %c0_i32_0 = arith.constant 0 : i32
    %c0_i32_1 = arith.constant 0 : i32
    return %c0_i32, %c0_i32_0 : i32, i32
  }
  func.func @transform_2(%arg0: i32) -> (i32, i32) {
    %c0_i32 = arith.constant 0 : i32
    %c0_i32_0 = arith.constant 0 : i32
    %c0_i32_1 = arith.constant 0 : i32
    return %c0_i32, %c0_i32_0 : i32, i32
  }
  func.func @transform_3(%arg0: i32) -> (i32, i32) {
    %c0_i32 = arith.constant 0 : i32
    %c0_i32_0 = arith.constant 0 : i32
    %c0_i32_1 = arith.constant 0 : i32
    return %c0_i32, %c0_i32_0 : i32, i32
  }
  func.func @transform_4(%arg0: i32) -> (i32, i32) {
    %c0_i32 = arith.constant 0 : i32
    %c0_i32_0 = arith.constant 0 : i32
    %c0_i32_1 = arith.constant 0 : i32
    return %c0_i32, %c0_i32_0 : i32, i32
  }
  func.func @transform_5(%arg0: i32) -> (i32, i32) {
    %c0_i32 = arith.constant 0 : i32
    %c0_i32_0 = arith.constant 0 : i32
    %c0_i32_1 = arith.constant 0 : i32
    return %c0_i32, %c0_i32_0 : i32, i32
  }
  func.func @transform_6(%arg0: i32) -> (i32, i32) {
    %c0_i32 = arith.constant 0 : i32
    %c0_i32_0 = arith.constant 0 : i32
    %c0_i32_1 = arith.constant 0 : i32
    return %c0_i32, %c0_i32_0 : i32, i32
  }
  func.func @transform_7(%arg0: i32) -> (i32, i32) {
    %c0_i32 = arith.constant 0 : i32
    %c0_i32_0 = arith.constant 0 : i32
    return %arg0, %c0_i32 : i32, i32
  }
}

</mosaic_0001>

<bundles_post_ra>
// kernel: tpu_custom_call.1
= control target key start
LH: loop header
LB: loop body
LE: loop exit
PB: predicated region body
PF: predicated region fallthrough
CT: control target
= control target key end

     0   :  { %12 = vsyncpa [#allocation3], 0  ;;  %s696_s0 = inlined_call_operand.hbm [shape: bf16[16,16], index: 0, kind: input, shape index: {}]   ;;  %s697_s1 = inlined_call_operand.hbm [shape: bf16[16,128], index: 1, kind: input, shape index: {}]   ;;  %s698_s2 = inlined_call_operand.vmem [shape: f32[1,128], index: 2, kind: input, shape index: {}]   ;;  %s699_s3 = inlined_call_operand.hbm [shape: bf16[128,128], index: 3, kind: input, shape index: {}]   ;;  %s700_s4 = inlined_call_operand.vmem [shape: f32[1,128], index: 4, kind: input, shape index: {}]   ;;  %s701_s5 = inlined_call_operand.hbm [shape: bf16[128,128], index: 5, kind: input, shape index: {}]   ;;  %s702_s6 = inlined_call_operand.vmem [shape: f32[1,128], index: 6, kind: input, shape index: {}]   ;;  %s703_s7 = inlined_call_operand.vmem [shape: f32[16,4], index: 7, kind: output, shape index: {}]  }
   0x1   :  { %13 = vsyncpa [#allocation5], 0 }
   0x2   :  { %14 = vsyncpa [#allocation8], 0  ;;  %s589_s24 = smov [#allocation4]   ;;  %s590_s26 = smov [#allocation2]  }
   0x3   :  { %s32_s25 = sshll.u32 %s589_s24, 4  ;;  %s20_s27 = sshll.u32 %s590_s26, 4  ;;  %s33_s25 = int_to_ptr.vmem [resolvable:$true] %s32_s25  ;;  %s21_s27 = int_to_ptr.vmem [resolvable:$true] %s20_s27 }
   0x4   :  { %s511_s28 = scalar_lea.vmem %s33_s25, 128  ;;  %p516_p1 = scmp.lt.s32.totalorder %s33_s25, %s33_s25 }
   0x5   :  { %p512_p0 = scmp.ne.s32.totalorder %s33_s25, %s511_s28  ;;  %p517_p2 = scmp.lt.s32.totalorder %s511_s28, %s511_s28 }
   0x7   :  { %p518_p3 = por %p517_p2, %p516_p1 }
   0x9   :  { %p519_p4 = pnand %p518_p3, %p512_p0 }
   0xb   :  { %522 = shalt.err (!%p519_p4)
}
   0xc   :  { %s591_s29 = smov 64   ;;  %s592_s30 = smov 4  }
   0xd   :  { %38 = dma.hbm_to_vmem [thread:$0]  %s697_s1, 128, %s33_s25, [#allocation5], %s591_s29, %s591_s29, %s592_s30  }
   0xe   :  { %s531_s10 = scalar_lea.vmem %s21_s27, 128  ;;  %p536_p6 = scmp.lt.s32.totalorder %s21_s27, %s21_s27 }
   0xf   :  { %p532_p5 = scmp.ne.s32.totalorder %s21_s27, %s531_s10  ;;  %p537_p7 = scmp.lt.s32.totalorder %s531_s10, %s531_s10 }
  0x11   :  { %p538_p8 = por %p537_p7, %p536_p6 }
  0x13   :  { %p539_p9 = pnand %p538_p8, %p532_p5 }
  0x15   :  { %542 = shalt.err (!%p539_p9)
}
  0x16   :  { %26 = dma.hbm_to_vmem [thread:$0]  %s696_s0, 128, %s21_s27, [#allocation3], %s591_s29, %s591_s29, %s592_s30  }
  0x17   :  { %s593_s13 = smov [#allocation6]   ;;  %s594_s15 = smov [#allocation7]  }
  0x18   :  { %s46_s14 = sshll.u32 %s593_s13, 4  ;;  %s60_s16 = sshll.u32 %s594_s15, 4  ;;  %s47_s14 = int_to_ptr.vmem [resolvable:$true] %s46_s14  ;;  %s61_s16 = int_to_ptr.vmem [resolvable:$true] %s60_s16 }
  0x19   :  { %s551_s1 = scalar_lea.vmem %s47_s14, 1024  ;;  %p556_p11 = scmp.lt.s32.totalorder %s47_s14, %s47_s14 }
  0x1a   :  { %p552_p10 = scmp.ne.s32.totalorder %s47_s14, %s551_s1  ;;  %p557_p12 = scmp.lt.s32.totalorder %s551_s1, %s551_s1 }
  0x1c   :  { %p558_p13 = por %p557_p12, %p556_p11 }
  0x1e   :  { %p559_p0 = pnand %p558_p13, %p552_p10 }
  0x20   :  { %562 = shalt.err (!%p559_p0)
}
  0x21   :  { %52 = dma.hbm_to_vmem [thread:$0]  %s699_s3, 1024, %s47_s14, [#allocation5], %s591_s29, %s591_s29, %s592_s30  }
  0x22   :  { %s571_s0 = scalar_lea.vmem %s61_s16, 1024  ;;  %p576_p2 = scmp.lt.s32.totalorder %s61_s16, %s61_s16 }
  0x23   :  { %p572_p1 = scmp.ne.s32.totalorder %s61_s16, %s571_s0  ;;  %p577_p3 = scmp.lt.s32.totalorder %s571_s0, %s571_s0 }
  0x25   :  { %p578_p4 = por %p577_p3, %p576_p2 }
  0x27   :  { %p579_p5 = pnand %p578_p4, %p572_p1 }
  0x29   :  { %582 = shalt.err (!%p579_p5)
}
  0x2a   :  { %66 = dma.hbm_to_vmem [thread:$0]  %s701_s5, 1024, %s61_s16, [#allocation8], %s591_s29, %s591_s29, %s592_s30  }
  0x2b   :  { %583 = dma.done.wait [#allocation3], 128  }
  0x2c   :  { %584 = vsyncadd [#allocation3], 4294967168 }
  0x2d   :  { %585 = dma.done.wait [#allocation5], 1152  }
  0x2e   :  { %586 = vsyncadd [#allocation5], 4294966144 }
  0x2f   :  { %587 = dma.done.wait [#allocation8], 1024  }
  0x30   :  { %588 = vsyncadd [#allocation8], 4294966272  ;;  %v595_v0 = vmov 0.0   ;;  %vm596_vm0 = vmmov 0   ;;  %v485_v1 = vld [vmem:[#allocation4] sm:$0xff]   ;;  %v486_v2 = vld [vmem:[#allocation2] sm:$0xff]  }
  0x31   :  { %431 = vmatprep.subr.bf16.mxu0 %v595_v0  ;;  %433 = vmatprep.mubr.msk.bf16.mxu0 %vm596_vm0, %v595_v0  ;;  %vm104_vm1 = vcmask 130048   ;;  %v487_v3 = vld [vmem:[#allocation6 + $0x38] sm:$0xff]   ;;  %v488_v4 = vld [vmem:[#allocation6 + $0x30] sm:$0xff]   ;;  %v489_v5 = vld [vmem:[#allocation6 + $0x28] sm:$0xff]   ;;  %vm379_vm2 = vcmask 31744  }
  0x32   :  { %437 = vmatprep.subr.bf16.mxu1 %v595_v0  ;;  %453 = vmatprep.mubr.msk.bf16.mxu1 %vm596_vm0, %v595_v0  ;;  %v490_v6 = vld [vmem:[#allocation6 + $0x20] sm:$0xff]   ;;  %v491_v7 = vld [vmem:[#allocation6 + $0x18] sm:$0xff]   ;;  %v492_v8 = vld [vmem:[#allocation6 + $0x10] sm:$0xff]  }
  0x33   :  { %432 = vmatpush3.bf16.msra.mxu0 %v485_v1  ;;  %438 = vmatpush3.bf16.msra.mxu1 %v487_v3  ;;  %v493_v9 = vld [vmem:[#allocation6 + $0x8] sm:$0xff]   ;;  %v494_v10 = vld [vmem:[#allocation6] sm:$0xff]   ;;  %v495_v11 = vld [vmem:[#allocation7 + $0x38] sm:$0xff]  }
  0x34   :  { %457 = vmatprep.subr.bf16.mxu0 %v595_v0  ;;  %439 = vmatprep.subr.bf16.mxu1 %v595_v0  ;;  %v496_v12 = vld [vmem:[#allocation7 + $0x30] sm:$0xff]   ;;  %v497_v13 = vld [vmem:[#allocation7 + $0x28] sm:$0xff]   ;;  %v498_v14 = vld [vmem:[#allocation7 + $0x20] sm:$0xff]  }
  0x35   :  { %v499_v15 = vld [vmem:[#allocation7 + $0x18] sm:$0xff]   ;;  %v389_v16 = vld [vmem:[%s698_s2] ss:$0 sm:$0xff]  ;;  %v501_v27 = vld [vmem:[#allocation7 + $0x8] sm:$0xff]  }
  0x36   :  { %434 = vmatmul.mubr.msk.bf16.vlgmr.msra.gmra.mxu0 %vm104_vm1, %v486_v2  ;;  %v500_v26 = vld [vmem:[#allocation7 + $0x10] sm:$0xff]   ;;  %v502_v28 = vld [vmem:[#allocation7] sm:$0xff]  }
  0x37   :  { %473 = vmatprep.mubr.msk.bf16.mxu0 %vm596_vm0, %v595_v0  ;;  %440 = vmatpush3.bf16.msra.mxu1 %v488_v4  ;;  %v393_v29 = vld [vmem:[%s700_s4] ss:$0 sm:$0xff] }
  0x38   :  { %441 = vmatprep.subr.bf16.mxu1 %v595_v0  ;;  %458 = vmatpush3.bf16.msra.mxu0 %v495_v11  ;;  %v402_v39 = vld [vmem:[%s702_s6] ss:$0 sm:$0xff] }
  0x39   :  { %459 = vmatprep.subr.bf16.mxu0 %v595_v0 }
  0x3b   :  { %442 = vmatpush3.bf16.msra.mxu1 %v489_v5 }
  0x3c   :  { %443 = vmatprep.subr.bf16.mxu1 %v595_v0  ;;  %460 = vmatpush3.bf16.msra.mxu0 %v496_v12 }
  0x3d   :  { %461 = vmatprep.subr.bf16.mxu0 %v595_v0 }
  0x3f   :  { %444 = vmatpush3.bf16.msra.mxu1 %v490_v6 }
  0x40   :  { %445 = vmatprep.subr.bf16.mxu1 %v595_v0  ;;  %462 = vmatpush3.bf16.msra.mxu0 %v497_v13 }
  0x41   :  { %463 = vmatprep.subr.bf16.mxu0 %v595_v0 }
  0x43   :  { %446 = vmatpush3.bf16.msra.mxu1 %v491_v7 }
  0x44   :  { %447 = vmatprep.subr.bf16.mxu1 %v595_v0  ;;  %464 = vmatpush3.bf16.msra.mxu0 %v498_v14 }
  0x45   :  { %465 = vmatprep.subr.bf16.mxu0 %v595_v0 }
  0x47   :  { %448 = vmatpush3.bf16.msra.mxu1 %v492_v8 }
  0x48   :  { %449 = vmatprep.subr.bf16.mxu1 %v595_v0  ;;  %466 = vmatpush3.bf16.msra.mxu0 %v499_v15 }
  0x49   :  { %467 = vmatprep.subr.bf16.mxu0 %v595_v0 }
  0x4b   :  { %450 = vmatpush3.bf16.msra.mxu1 %v493_v9 }
  0x4c   :  { %451 = vmatprep.subr.bf16.mxu1 %v595_v0  ;;  %468 = vmatpush3.bf16.msra.mxu0 %v500_v26 }
  0x4d   :  { %469 = vmatprep.subr.bf16.mxu0 %v595_v0 }
  0x4f   :  { %452 = vmatpush3.bf16.msra.mxu1 %v494_v10 }
  0x50   :  { %470 = vmatpush3.bf16.msra.mxu0 %v501_v27 }
  0x51   :  { %471 = vmatprep.subr.bf16.mxu0 %v595_v0 }
  0x54   :  { %472 = vmatpush3.bf16.msra.mxu0 %v502_v28 }
  0xf6   :  { %v142_v17 = vpop.f32.mrf.mxu0 }
  0xf7   :  { %v143_v19 = vadd.f32 %v389_v16, %v142_v17 }
  0xf8   :  { %v435_v18 = vpop.f32.mrf.mxu0 }
  0xf9   :  { %v149_v23 = vmax.f32 %v143_v19, 0.0 }
  0xfa   :  { %v145_v20 = vpop.f32.mrf.mxu0 }
  0xfb   :  { %v146_v21 = vadd.f32 %v389_v16, %v145_v20 }
  0xfc   :  { %v436_v22 = vpop.f32.mrf.mxu0 }
  0xfd   :  { %v150_v24 = vmax.f32 %v146_v21, 0.0 }
  0xff   :  { %v151_v25 = vpack.c.bf16 %v150_v24, %v149_v23 }
 0x101   :  { %454 = vmatmul.mubr.bf16.vlgmr.msra.gmra.mxu1 %v151_v25 }
 0x1c1   :  { %v257_v30 = vpop.f32.mrf.mxu1 }
 0x1c2   :  { %v258_v32 = vadd.f32 %v393_v29, %v257_v30 }
 0x1c3   :  { %v455_v31 = vpop.f32.mrf.mxu1 }
 0x1c4   :  { %v264_v36 = vmax.f32 %v258_v32, 0.0 }
 0x1c5   :  { %v260_v33 = vpop.f32.mrf.mxu1 }
 0x1c6   :  { %v261_v34 = vadd.f32 %v393_v29, %v260_v33 }
 0x1c7   :  { %v456_v35 = vpop.f32.mrf.mxu1 }
 0x1c8   :  { %v265_v37 = vmax.f32 %v261_v34, 0.0 }
 0x1ca   :  { %v266_v38 = vpack.c.bf16 %v265_v37, %v264_v36 }
 0x1cc   :  { %474 = vmatmul.mubr.bf16.vlgmr.msra.gmra.mxu0 %v266_v38 }
 0x28c   :  { %v372_v40 = vpop.f32.mrf.mxu0 }
 0x28d   :  { %v373_v41 = vadd.f32 %v402_v39, %v372_v40 }
 0x28e   :  { %v475_v42 = vpop.f32.mrf.mxu0 }
 0x28f   :  { %380 = vst.msk [vmem:[%s703_s7] sm:$0xff] %vm379_vm2, %v373_v41 }
 0x290   :  { %v375_v43 = vpop.f32.mrf.mxu0 }
 0x291   :  { %v376_v44 = vadd.f32 %v402_v39, %v375_v43 }
 0x292   :  { %v476_v45 = vpop.f32.mrf.mxu0 }
 0x293   :  { %381 = vst.msk [vmem:[%s703_s7 + $0x8] sm:$0xff] %vm379_vm2, %v376_v44 }
 0x294   :  { %386 = vsyncpa [#allocation3], 1 }
 0x295   :  { %387 = vsyncpa [#allocation5], 1 }
 0x296   :  { %388 = vsyncpa [#allocation8], 1 }

</bundles_post_ra>
